<compile_context>
chip_gen: v7x
topology: tpu7x:2x2x1
jax: 0.10.0
libtpu: 0.0.40
codegen_flags: <defaults>
</compile_context>

<pallas_src>
import numpy as np
import jax
import jax.numpy as jnp
from jax.experimental import pallas as pl
from jax.experimental.pallas import tpu as pltpu


def _cell_b_kernel(x_ref, w1_ref, b1_ref, w2_ref, b2_ref, a_ref, s_ref, out_ref):
    # x_ref  : (1, ins, BL_in)     batch-chunk slab, lanes = (local batch, pos)
    # w1_ref : (CA, ins)           Conv_B weight (1x1 conv == channel matmul)
    # b1_ref : (CA, 1)             Conv_B bias
    # w2_ref : (gB, OC, CA)        psi_k_B weight, tap-major
    # b2_ref : (OC, 1)             psi_k_B bias
    # a_ref  : (gB, BL_in, BL_out) per-tap band-selection matrices (conv -> matmul)
    # s_ref  : (BL_out, BL_out)    block-diag segment matrix (squash reduce+broadcast)
    # out_ref: (1, OC, BL_out)     lane-dense flat output slab for this chunk
    x = x_ref[0]                                                       # (ins, BL_in)

    # Conv1d, kernel_size=1  ==  channel matmul + bias.
    xc = jnp.dot(w1_ref[...], x, preferred_element_type=jnp.float32)   # (CA, BL_in)
    xc = xc + b1_ref[...]

    # Strided Conv2d (kernel (CA,gB), stride (CA,1), pad (0,2)) expressed as gB
    # lane-dense matmul pairs; the reshape/permute of the PyTorch forward and
    # the batch packing are already baked into the A_k selection matrices.
    gB = w2_ref.shape[0]
    y = None
    for k in range(gB):                                                # static, tiny
        mk = jnp.dot(w2_ref[k], xc, preferred_element_type=jnp.float32)   # (OC, BL_in)
        yk = jnp.dot(mk, a_ref[k], preferred_element_type=jnp.float32)    # (OC, BL_out)
        y = yk if y is None else y + yk
    y = y + b2_ref[...]                                                # (OC, BL_out)

    # Squash: per-(capsule, batch, row) squared norm over its W_out segment,
    # broadcast back over the segment via the block-diagonal S matrix.
    sq = jnp.dot(y * y, s_ref[...], preferred_element_type=jnp.float32)   # (OC, BL_out)
    out_ref[0] = (sq / (1.0 + sq) * y / (sq + 1e-8)).astype(out_ref.dtype)


def cell_b_forward(x, w1, b1, w2, b2, *, cb, ab, Ln, n, cSB, aSB, gB):
    """x: (B, ins, L); w1: (outs, ins); b1: (outs,); w2: (OC, 1, cb*ab, gB); b2: (OC,)."""
    assert gB % 2 == 1, "[gB] needs to be odd"
    pad = int(5 / 2 - 0.5)            # == 2, hard-coded exactly as in the PyTorch module
    CA = cb * ab
    OC = cSB * aSB
    B, ins, L = x.shape
    outs = w1.shape[0]
    # TODO(synk): configs where outs*L != cb*ab*n*Ln make the PyTorch reshape change the
    # batch dimension mid-forward; only the standard layout (outs==cb*ab, L==n*Ln) is handled.
    assert outs == CA and L == n * Ln
    W_out = Ln + 2 * pad - gB + 1
    assert W_out >= 1
    L_in, L_out = n * Ln, n * W_out

    # Pack Bt batches per grid step so the lane dim is ~128 (lane-dense stores).
    Bt = max(1, min(B, (128 + L_in - 1) // L_in))
    nb = (B + Bt - 1) // Bt
    Bp = nb * Bt
    BL_in, BL_out = Bt * L_in, Bt * L_out

    # Precompute (tiny, host-side) the per-tap band matrices and the segment matrix.
    # Per-segment band a_k (Ln, W_out), then block-diag over the Bt*n packed segments.
    A1 = np.zeros((gB, Ln, W_out), np.float32)
    for k in range(gB):
        for wo in range(W_out):
            u = wo + k - pad
            if 0 <= u < Ln:
                A1[k, u, wo] = 1.0
    eye_seg = np.eye(Bt * n, dtype=np.float32)
    A = np.stack([np.kron(eye_seg, A1[k]) for k in range(gB)])      # (gB, BL_in, BL_out)
    S = np.kron(eye_seg, np.ones((W_out, W_out), np.float32))       # (BL_out, BL_out)

    # Layout plumbing in the wrapper (not the kernel).
    x32 = x.astype(jnp.float32)
    if Bp != B:
        x32 = jnp.pad(x32, ((0, Bp - B), (0, 0), (0, 0)))
    x_in = x32.reshape(nb, Bt, ins, L_in).transpose(0, 2, 1, 3).reshape(nb, ins, BL_in)
    w1_2d = w1.astype(jnp.float32)                                   # (CA, ins)
    b1_2d = b1.astype(jnp.float32).reshape(CA, 1)
    w2_t = jnp.transpose(w2.astype(jnp.float32)[:, 0], (2, 0, 1))    # (gB, OC, CA)
    b2_2d = b2.astype(jnp.float32).reshape(OC, 1)

    y_flat = pl.pallas_call(
        _cell_b_kernel,
        out_shape=jax.ShapeDtypeStruct((nb, OC, BL_out), jnp.float32),
        grid=(nb,),
        in_specs=[
            pl.BlockSpec((1, ins, BL_in), lambda c: (c, 0, 0)),
            pl.BlockSpec((CA, ins), lambda c: (0, 0)),
            pl.BlockSpec((CA, 1), lambda c: (0, 0)),
            pl.BlockSpec((gB, OC, CA), lambda c: (0, 0, 0)),
            pl.BlockSpec((OC, 1), lambda c: (0, 0)),
            pl.BlockSpec((gB, BL_in, BL_out), lambda c: (0, 0, 0)),
            pl.BlockSpec((BL_out, BL_out), lambda c: (0, 0)),
        ],
        out_specs=pl.BlockSpec((1, OC, BL_out), lambda c: (c, 0, 0)),
        compiler_params=pltpu.CompilerParams(
            dimension_semantics=("parallel",)),
    )(x_in, w1_2d, b1_2d, w2_t, b2_2d, jnp.asarray(A), jnp.asarray(S))

    y = (y_flat.reshape(nb, OC, Bt, n, W_out)
               .transpose(0, 2, 1, 3, 4)
               .reshape(Bp, OC, n, W_out))
    return y[:B]


def cell_b_reference(x, w1, b1, w2, b2, *, cb, ab, Ln, n, gB):
    """Pure-JAX reference mirroring the PyTorch module (in float32)."""
    CA = cb * ab
    pad = int(5 / 2 - 0.5)
    B = x.shape[0]
    xc = jnp.einsum("oi,bil->bol", w1, x,
                    precision=jax.lax.Precision.HIGHEST) + b1[None, :, None]
    xr = xc.reshape(B, CA, n, Ln).transpose(0, 2, 1, 3).reshape(B, 1, n * CA, Ln)
    y = jax.lax.conv_general_dilated(
        xr, w2, window_strides=(CA, 1), padding=((0, 0), (pad, pad)),
        dimension_numbers=("NCHW", "OIHW", "NCHW"),
        precision=jax.lax.Precision.HIGHEST)
    y = y + b2[None, :, None, None]
    sq = jnp.sum(y * y, axis=-1, keepdims=True)
    return sq / (1.0 + sq) * y / (sq + 1e-8)


if __name__ == "__main__":
    # Small shapes consistent with the module.
    cb, ab = 2, 2              # CA = 4
    ins, outs = 3, 4           # outs == cb*ab (standard layout)
    Ln, n = 16, 4
    cSB, aSB = 2, 4            # OC = 8
    gB = 5                     # odd, matches the hard-coded padding of 2
    B = 2
    CA, OC, L = cb * ab, cSB * aSB, n * Ln

    key = jax.random.PRNGKey(0)
    k1, k2, k3, k4, kx, kx2 = jax.random.split(key, 6)
    w1 = jax.random.normal(k1, (outs, ins), jnp.float32) * (1.0 / ins) ** 0.5
    b1 = jax.random.normal(k2, (outs,), jnp.float32) * 0.1
    w2 = jax.random.normal(k3, (OC, 1, CA, gB), jnp.float32) * (1.0 / (CA * gB)) ** 0.5
    b2 = jax.random.normal(k4, (OC,), jnp.float32) * 0.1
    x = jax.random.normal(kx, (B, ins, L), jnp.float32) * 0.5

    W_out = Ln + 2 * 2 - gB + 1

    out = jax.block_until_ready(
        cell_b_forward(x, w1, b1, w2, b2,
                       cb=cb, ab=ab, Ln=Ln, n=n, cSB=cSB, aSB=aSB, gB=gB))
    ref = jax.block_until_ready(
        cell_b_reference(x, w1, b1, w2, b2, cb=cb, ab=ab, Ln=Ln, n=n, gB=gB))
    assert out.shape == (B, OC, n, W_out) and ref.shape == out.shape, (out.shape, ref.shape)
    assert jnp.allclose(out, ref, rtol=5e-3, atol=5e-4), float(jnp.max(jnp.abs(out - ref)))

    # Second config: odd batch (exercises the batch-chunk padding path).
    B2 = 3
    x2 = jax.random.normal(kx2, (B2, ins, L), jnp.float32) * 0.5
    out2 = jax.block_until_ready(
        cell_b_forward(x2, w1, b1, w2, b2,
                       cb=cb, ab=ab, Ln=Ln, n=n, cSB=cSB, aSB=aSB, gB=gB))
    ref2 = jax.block_until_ready(
        cell_b_reference(x2, w1, b1, w2, b2, cb=cb, ab=ab, Ln=Ln, n=n, gB=gB))
    assert out2.shape == (B2, OC, n, W_out) and ref2.shape == out2.shape
    assert jnp.allclose(out2, ref2, rtol=5e-3, atol=5e-4), float(jnp.max(jnp.abs(out2 - ref2)))

    print("KERNEL_OK")
</pallas_src>

<mosaic_0001>
module attributes {stable_mosaic.version = 11 : i64} {
  func.func @_cell_b_kernel(%arg0: i32, %arg1: memref<1x3x128xf32, #tpu.memory_space<vmem>>, %arg2: memref<4x3xf32, #tpu.memory_space<vmem>>, %arg3: memref<4x1xf32, #tpu.memory_space<vmem>>, %arg4: memref<5x8x4xf32, #tpu.memory_space<vmem>>, %arg5: memref<8x1xf32, #tpu.memory_space<vmem>>, %arg6: memref<5x128x128xf32, #tpu.memory_space<vmem>>, %arg7: memref<128x128xf32, #tpu.memory_space<vmem>>, %arg8: memref<1x8x128xf32, #tpu.memory_space<vmem>>) attributes {dimension_semantics = [#tpu.dimension_semantics<parallel>], iteration_bounds = array<i64: 1>, scalar_prefetch = 0 : i64, scratch_operands = 0 : i64, tpu.core_type = #tpu.core_type<tc>, window_params = [{transform_indices = @transform_0, window_bounds = array<i64: 1, 3, 128>}, {pipeline_mode = #tpu.pipeline_mode<synchronous>, transform_indices = @transform_1, window_bounds = array<i64: 4, 3>}, {pipeline_mode = #tpu.pipeline_mode<synchronous>, transform_indices = @transform_2, window_bounds = array<i64: 4, 1>}, {pipeline_mode = #tpu.pipeline_mode<synchronous>, transform_indices = @transform_3, window_bounds = array<i64: 5, 8, 4>}, {pipeline_mode = #tpu.pipeline_mode<synchronous>, transform_indices = @transform_4, window_bounds = array<i64: 8, 1>}, {pipeline_mode = #tpu.pipeline_mode<synchronous>, transform_indices = @transform_5, window_bounds = array<i64: 5, 128, 128>}, {pipeline_mode = #tpu.pipeline_mode<synchronous>, transform_indices = @transform_6, window_bounds = array<i64: 128, 128>}, {transform_indices = @transform_7, window_bounds = array<i64: 1, 8, 128>}]} {
    %c0 = arith.constant 0 : index
    %c0_0 = arith.constant 0 : index
    %c0_1 = arith.constant 0 : index
    %0 = vector.load %arg1[%c0, %c0_0, %c0_1] : memref<1x3x128xf32, #tpu.memory_space<vmem>>, vector<1x3x128xf32>
    %1 = vector.shape_cast %0 : vector<1x3x128xf32> to vector<3x128xf32>
    %c0_2 = arith.constant 0 : index
    %c0_3 = arith.constant 0 : index
    %2 = vector.load %arg2[%c0_2, %c0_3] : memref<4x3xf32, #tpu.memory_space<vmem>>, vector<4x3xf32>
    %cst = arith.constant dense<0.000000e+00> : vector<4x128xf32>
    %3 = tpu.matmul %2, %1, %cst {dimension_numbers = #tpu.dot_dimension_numbers<[1], [0], [0], [1], [0, 0, 1, 1], [], []>} : vector<4x3xf32>, vector<3x128xf32>, vector<4x128xf32> -> vector<4x128xf32>
    %c0_4 = arith.constant 0 : index
    %c0_5 = arith.constant 0 : index
    %4 = vector.load %arg3[%c0_4, %c0_5] : memref<4x1xf32, #tpu.memory_space<vmem>>, vector<4x1xf32>
    %5 = vector.broadcast %4 : vector<4x1xf32> to vector<4x128xf32>
    %6 = arith.addf %3, %5 : vector<4x128xf32>
    %c0_6 = arith.constant 0 : index
    %c0_7 = arith.constant 0 : index
    %c0_8 = arith.constant 0 : index
    %7 = vector.load %arg4[%c0_6, %c0_7, %c0_8] : memref<5x8x4xf32, #tpu.memory_space<vmem>>, vector<1x8x4xf32>
    %8 = vector.shape_cast %7 : vector<1x8x4xf32> to vector<8x4xf32>
    %cst_9 = arith.constant dense<0.000000e+00> : vector<8x128xf32>
    %9 = tpu.matmul %8, %6, %cst_9 {dimension_numbers = #tpu.dot_dimension_numbers<[1], [0], [0], [1], [0, 0, 1, 1], [], []>} : vector<8x4xf32>, vector<4x128xf32>, vector<8x128xf32> -> vector<8x128xf32>
    %c0_10 = arith.constant 0 : index
    %c0_11 = arith.constant 0 : index
    %c0_12 = arith.constant 0 : index
    %10 = vector.load %arg6[%c0_10, %c0_11, %c0_12] : memref<5x128x128xf32, #tpu.memory_space<vmem>>, vector<1x128x128xf32>
    %11 = vector.shape_cast %10 : vector<1x128x128xf32> to vector<128x128xf32>
    %cst_13 = arith.constant dense<0.000000e+00> : vector<8x128xf32>
    %12 = tpu.matmul %9, %11, %cst_13 {dimension_numbers = #tpu.dot_dimension_numbers<[1], [0], [0], [1], [0, 0, 1, 1], [], []>} : vector<8x128xf32>, vector<128x128xf32>, vector<8x128xf32> -> vector<8x128xf32>
    %c1 = arith.constant 1 : index
    %c0_14 = arith.constant 0 : index
    %c0_15 = arith.constant 0 : index
    %13 = vector.load %arg4[%c1, %c0_14, %c0_15] : memref<5x8x4xf32, #tpu.memory_space<vmem>>, vector<1x8x4xf32>
    %14 = vector.shape_cast %13 : vector<1x8x4xf32> to vector<8x4xf32>
    %cst_16 = arith.constant dense<0.000000e+00> : vector<8x128xf32>
    %15 = tpu.matmul %14, %6, %cst_16 {dimension_numbers = #tpu.dot_dimension_numbers<[1], [0], [0], [1], [0, 0, 1, 1], [], []>} : vector<8x4xf32>, vector<4x128xf32>, vector<8x128xf32> -> vector<8x128xf32>
    %c1_17 = arith.constant 1 : index
    %c0_18 = arith.constant 0 : index
    %c0_19 = arith.constant 0 : index
    %16 = vector.load %arg6[%c1_17, %c0_18, %c0_19] : memref<5x128x128xf32, #tpu.memory_space<vmem>>, vector<1x128x128xf32>
    %17 = vector.shape_cast %16 : vector<1x128x128xf32> to vector<128x128xf32>
    %cst_20 = arith.constant dense<0.000000e+00> : vector<8x128xf32>
    %18 = tpu.matmul %15, %17, %cst_20 {dimension_numbers = #tpu.dot_dimension_numbers<[1], [0], [0], [1], [0, 0, 1, 1], [], []>} : vector<8x128xf32>, vector<128x128xf32>, vector<8x128xf32> -> vector<8x128xf32>
    %19 = arith.addf %12, %18 : vector<8x128xf32>
    %c2 = arith.constant 2 : index
    %c0_21 = arith.constant 0 : index
    %c0_22 = arith.constant 0 : index
    %20 = vector.load %arg4[%c2, %c0_21, %c0_22] : memref<5x8x4xf32, #tpu.memory_space<vmem>>, vector<1x8x4xf32>
    %21 = vector.shape_cast %20 : vector<1x8x4xf32> to vector<8x4xf32>
    %cst_23 = arith.constant dense<0.000000e+00> : vector<8x128xf32>
    %22 = tpu.matmul %21, %6, %cst_23 {dimension_numbers = #tpu.dot_dimension_numbers<[1], [0], [0], [1], [0, 0, 1, 1], [], []>} : vector<8x4xf32>, vector<4x128xf32>, vector<8x128xf32> -> vector<8x128xf32>
    %c2_24 = arith.constant 2 : index
    %c0_25 = arith.constant 0 : index
    %c0_26 = arith.constant 0 : index
    %23 = vector.load %arg6[%c2_24, %c0_25, %c0_26] : memref<5x128x128xf32, #tpu.memory_space<vmem>>, vector<1x128x128xf32>
    %24 = vector.shape_cast %23 : vector<1x128x128xf32> to vector<128x128xf32>
    %cst_27 = arith.constant dense<0.000000e+00> : vector<8x128xf32>
    %25 = tpu.matmul %22, %24, %cst_27 {dimension_numbers = #tpu.dot_dimension_numbers<[1], [0], [0], [1], [0, 0, 1, 1], [], []>} : vector<8x128xf32>, vector<128x128xf32>, vector<8x128xf32> -> vector<8x128xf32>
    %26 = arith.addf %19, %25 : vector<8x128xf32>
    %c3 = arith.constant 3 : index
    %c0_28 = arith.constant 0 : index
    %c0_29 = arith.constant 0 : index
    %27 = vector.load %arg4[%c3, %c0_28, %c0_29] : memref<5x8x4xf32, #tpu.memory_space<vmem>>, vector<1x8x4xf32>
    %28 = vector.shape_cast %27 : vector<1x8x4xf32> to vector<8x4xf32>
    %cst_30 = arith.constant dense<0.000000e+00> : vector<8x128xf32>
    %29 = tpu.matmul %28, %6, %cst_30 {dimension_numbers = #tpu.dot_dimension_numbers<[1], [0], [0], [1], [0, 0, 1, 1], [], []>} : vector<8x4xf32>, vector<4x128xf32>, vector<8x128xf32> -> vector<8x128xf32>
    %c3_31 = arith.constant 3 : index
    %c0_32 = arith.constant 0 : index
    %c0_33 = arith.constant 0 : index
    %30 = vector.load %arg6[%c3_31, %c0_32, %c0_33] : memref<5x128x128xf32, #tpu.memory_space<vmem>>, vector<1x128x128xf32>
    %31 = vector.shape_cast %30 : vector<1x128x128xf32> to vector<128x128xf32>
    %cst_34 = arith.constant dense<0.000000e+00> : vector<8x128xf32>
    %32 = tpu.matmul %29, %31, %cst_34 {dimension_numbers = #tpu.dot_dimension_numbers<[1], [0], [0], [1], [0, 0, 1, 1], [], []>} : vector<8x128xf32>, vector<128x128xf32>, vector<8x128xf32> -> vector<8x128xf32>
    %33 = arith.addf %26, %32 : vector<8x128xf32>
    %c4 = arith.constant 4 : index
    %c0_35 = arith.constant 0 : index
    %c0_36 = arith.constant 0 : index
    %34 = vector.load %arg4[%c4, %c0_35, %c0_36] : memref<5x8x4xf32, #tpu.memory_space<vmem>>, vector<1x8x4xf32>
    %35 = vector.shape_cast %34 : vector<1x8x4xf32> to vector<8x4xf32>
    %cst_37 = arith.constant dense<0.000000e+00> : vector<8x128xf32>
    %36 = tpu.matmul %35, %6, %cst_37 {dimension_numbers = #tpu.dot_dimension_numbers<[1], [0], [0], [1], [0, 0, 1, 1], [], []>} : vector<8x4xf32>, vector<4x128xf32>, vector<8x128xf32> -> vector<8x128xf32>
    %c4_38 = arith.constant 4 : index
    %c0_39 = arith.constant 0 : index
    %c0_40 = arith.constant 0 : index
    %37 = vector.load %arg6[%c4_38, %c0_39, %c0_40] : memref<5x128x128xf32, #tpu.memory_space<vmem>>, vector<1x128x128xf32>
    %38 = vector.shape_cast %37 : vector<1x128x128xf32> to vector<128x128xf32>
    %cst_41 = arith.constant dense<0.000000e+00> : vector<8x128xf32>
    %39 = tpu.matmul %36, %38, %cst_41 {dimension_numbers = #tpu.dot_dimension_numbers<[1], [0], [0], [1], [0, 0, 1, 1], [], []>} : vector<8x128xf32>, vector<128x128xf32>, vector<8x128xf32> -> vector<8x128xf32>
    %40 = arith.addf %33, %39 : vector<8x128xf32>
    %c0_42 = arith.constant 0 : index
    %c0_43 = arith.constant 0 : index
    %41 = vector.load %arg5[%c0_42, %c0_43] : memref<8x1xf32, #tpu.memory_space<vmem>>, vector<8x1xf32>
    %42 = vector.broadcast %41 : vector<8x1xf32> to vector<8x128xf32>
    %43 = arith.addf %40, %42 : vector<8x128xf32>
    %44 = arith.mulf %43, %43 : vector<8x128xf32>
    %c0_44 = arith.constant 0 : index
    %c0_45 = arith.constant 0 : index
    %45 = vector.load %arg7[%c0_44, %c0_45] : memref<128x128xf32, #tpu.memory_space<vmem>>, vector<128x128xf32>
    %cst_46 = arith.constant dense<0.000000e+00> : vector<8x128xf32>
    %46 = tpu.matmul %44, %45, %cst_46 {dimension_numbers = #tpu.dot_dimension_numbers<[1], [0], [0], [1], [0, 0, 1, 1], [], []>} : vector<8x128xf32>, vector<128x128xf32>, vector<8x128xf32> -> vector<8x128xf32>
    %cst_47 = arith.constant 1.000000e+00 : f32
    %47 = vector.broadcast %cst_47 : f32 to vector<8x128xf32>
    %48 = arith.addf %47, %46 : vector<8x128xf32>
    %49 = arith.divf %46, %48 : vector<8x128xf32>
    %50 = arith.mulf %49, %43 : vector<8x128xf32>
    %cst_48 = arith.constant 9.99999993E-9 : f32
    %51 = vector.broadcast %cst_48 : f32 to vector<8x128xf32>
    %52 = arith.addf %46, %51 : vector<8x128xf32>
    %53 = arith.divf %50, %52 : vector<8x128xf32>
    %c0_49 = arith.constant 0 : index
    %c0_50 = arith.constant 0 : index
    %c0_51 = arith.constant 0 : index
    %54 = vector.load %arg8[%c0_49, %c0_50, %c0_51] : memref<1x8x128xf32, #tpu.memory_space<vmem>>, vector<1x8x128xf32>
    %55 = vector.shape_cast %54 : vector<1x8x128xf32> to vector<8x128xf32>
    %56 = vector.shape_cast %53 : vector<8x128xf32> to vector<1x8x128xf32>
    tpu.vector_store %arg8[%c0_49, %c0_50, %c0_51], %56 {strides = array<i32>} : memref<1x8x128xf32, #tpu.memory_space<vmem>>, vector<1x8x128xf32>,
    return
  }
  func.func @transform_0(%arg0: i32) -> (i32, i32, i32) {
    %c0_i32 = arith.constant 0 : i32
    %c0_i32_0 = arith.constant 0 : i32
    %c0_i32_1 = arith.constant 0 : i32
    return %arg0, %c0_i32, %c0_i32_0 : i32, i32, i32
  }
  func.func @transform_1(%arg0: i32) -> (i32, i32) {
    %c0_i32 = arith.constant 0 : i32
    %c0_i32_0 = arith.constant 0 : i32
    %c0_i32_1 = arith.constant 0 : i32
    return %c0_i32, %c0_i32_0 : i32, i32
  }
  func.func @transform_2(%arg0: i32) -> (i32, i32) {
    %c0_i32 = arith.constant 0 : i32
    %c0_i32_0 = arith.constant 0 : i32
    %c0_i32_1 = arith.constant 0 : i32
    return %c0_i32, %c0_i32_0 : i32, i32
  }
  func.func @transform_3(%arg0: i32) -> (i32, i32, i32) {
    %c0_i32 = arith.constant 0 : i32
    %c0_i32_0 = arith.constant 0 : i32
    %c0_i32_1 = arith.constant 0 : i32
    %c0_i32_2 = arith.constant 0 : i32
    return %c0_i32, %c0_i32_0, %c0_i32_1 : i32, i32, i32
  }
  func.func @transform_4(%arg0: i32) -> (i32, i32) {
    %c0_i32 = arith.constant 0 : i32
    %c0_i32_0 = arith.constant 0 : i32
    %c0_i32_1 = arith.constant 0 : i32
    return %c0_i32, %c0_i32_0 : i32, i32
  }
  func.func @transform_5(%arg0: i32) -> (i32, i32, i32) {
    %c0_i32 = arith.constant 0 : i32
    %c0_i32_0 = arith.constant 0 : i32
    %c0_i32_1 = arith.constant 0 : i32
    %c0_i32_2 = arith.constant 0 : i32
    return %c0_i32, %c0_i32_0, %c0_i32_1 : i32, i32, i32
  }
  func.func @transform_6(%arg0: i32) -> (i32, i32) {
    %c0_i32 = arith.constant 0 : i32
    %c0_i32_0 = arith.constant 0 : i32
    %c0_i32_1 = arith.constant 0 : i32
    return %c0_i32, %c0_i32_0 : i32, i32
  }
  func.func @transform_7(%arg0: i32) -> (i32, i32, i32) {
    %c0_i32 = arith.constant 0 : i32
    %c0_i32_0 = arith.constant 0 : i32
    %c0_i32_1 = arith.constant 0 : i32
    return %arg0, %c0_i32, %c0_i32_0 : i32, i32, i32
  }
}

</mosaic_0001>

<bundles_post_ra>
// kernel: tpu_custom_call.1
= control target key start
LH: loop header
LB: loop body
LE: loop exit
PB: predicated region body
PF: predicated region fallthrough
CT: control target
= control target key end

     0   :  { %12 = vsyncpa [#allocation3], 0  ;;  %s1885_s0 = inlined_call_operand.vmem [shape: f32[1,3,128], index: 0, kind: input, shape index: {}]   ;;  %s1886_s1 = inlined_call_operand.vmem [shape: f32[4,3], index: 1, kind: input, shape index: {}]   ;;  %s1887_s2 = inlined_call_operand.vmem [shape: f32[4,1], index: 2, kind: input, shape index: {}]   ;;  %s1888_s3 = inlined_call_operand.vmem [shape: f32[5,8,4], index: 3, kind: input, shape index: {}]   ;;  %s1889_s4 = inlined_call_operand.vmem [shape: f32[8,1], index: 4, kind: input, shape index: {}]   ;;  %s1890_s5 = inlined_call_operand.hbm [shape: f32[5,128,128], index: 5, kind: input, shape index: {}]   ;;  %s1891_s6 = inlined_call_operand.hbm [shape: f32[128,128], index: 6, kind: input, shape index: {}]   ;;  %s1892_s7 = inlined_call_operand.hbm [shape: f32[1,8,128], index: 7, kind: output, shape index: {}]  }
   0x1   :  { %13 = vsyncpa [#allocation6], 0 }
   0x2   :  { %14 = vsyncpa [#allocation4], 0  ;;  %s1675_s24 = smov [#allocation2]   ;;  %s1603_s28 = scalar_lea.hbm %s1890_s5, 10240 }
   0x3   :  { %s30_s25 = sshll.u32 %s1675_s24, 4  ;;  %p1604_p0 = scmp.ne.s32.totalorder %s1890_s5, %s1603_s28  ;;  %s31_s25 = int_to_ptr.vmem [resolvable:$true] %s30_s25 }
   0x4   :  { %p1607_p1 = scmp.lt.u32.totalorder %s1603_s28, %s1890_s5 }
   0x6   :  { %p1609_p2 = pnand %p1607_p1, %p1604_p0 }
   0x8   :  { %1612 = shalt.err (!%p1609_p2)
}
   0x9   :  { %s1613_s10 = scalar_lea.vmem %s31_s25, 10240  ;;  %p1618_p4 = scmp.lt.s32.totalorder %s31_s25, %s31_s25 }
   0xa   :  { %p1614_p3 = scmp.ne.s32.totalorder %s31_s25, %s1613_s10  ;;  %p1619_p5 = scmp.lt.s32.totalorder %s1613_s10, %s1613_s10 }
   0xc   :  { %p1620_p6 = por %p1619_p5, %p1618_p4 }
   0xe   :  { %p1621_p7 = pnand %p1620_p6, %p1614_p3 }
  0x10   :  { %1624 = shalt.err (!%p1621_p7)
}
  0x11   :  { %s1676_s11 = smov 128   ;;  %s1677_s12 = smov 8  }
  0x12   :  { %36 = dma.hbm_to_vmem [thread:$0]  %s1890_s5, 10240, %s31_s25, [#allocation3], %s1676_s11, %s1676_s11, %s1677_s12  }
  0x13   :  { %s1678_s15 = smov [#allocation5]   ;;  %s1625_s19 = scalar_lea.hbm %s1891_s6, 2048 }
  0x14   :  { %s42_s16 = sshll.u32 %s1678_s15, 4  ;;  %p1626_p8 = scmp.ne.s32.totalorder %s1891_s6, %s1625_s19  ;;  %s43_s16 = int_to_ptr.vmem [resolvable:$true] %s42_s16 }
  0x15   :  { %p1629_p9 = scmp.lt.u32.totalorder %s1625_s19, %s1891_s6 }
  0x17   :  { %p1631_p10 = pnand %p1629_p9, %p1626_p8 }
  0x19   :  { %1634 = shalt.err (!%p1631_p10)
}
  0x1a   :  { %s1635_s24 = scalar_lea.vmem %s43_s16, 2048  ;;  %p1640_p12 = scmp.lt.s32.totalorder %s43_s16, %s43_s16 }
  0x1b   :  { %p1636_p11 = scmp.ne.s32.totalorder %s43_s16, %s1635_s24  ;;  %p1641_p13 = scmp.lt.s32.totalorder %s1635_s24, %s1635_s24 }
  0x1d   :  { %p1642_p0 = por %p1641_p13, %p1640_p12 }
  0x1f   :  { %p1643_p1 = pnand %p1642_p0, %p1636_p11 }
  0x21   :  { %1646 = shalt.err (!%p1643_p1)
}
  0x22   :  { %48 = dma.hbm_to_vmem [thread:$0]  %s1891_s6, 2048, %s43_s16, [#allocation6], %s1676_s11, %s1676_s11, %s1677_s12  }
  0x23   :  { %1669 = dma.done.wait [#allocation3], 10240  }
  0x24   :  { %1670 = vsyncadd [#allocation3], 4294957056 }
  0x25   :  { %1671 = dma.done.wait [#allocation6], 2048  }
  0x26   :  { %1672 = vsyncadd [#allocation6], 4294965248  ;;  %v1679_v0 = vmov 0.0   ;;  %vm1680_vm0 = vmmov 0   ;;  %v1681_v1 = vmov 0   ;;  %vm67_vm1 = vcmask 1042432  }
  0x27   :  { %1205 = vmatprep.subr.mxu0 %v1679_v0  ;;  %1207 = vmatprep.mubr.msk.f32.mxu0 %vm1680_vm0, %v1679_v0  ;;  %vm63_vm2 = vcmask 23552   ;;  %v55_v2 = vld [vmem:[%s1885_s0] sm:$0x7]  ;;  %v312_v6 = vld [vmem:[#allocation2 + $0x80] sm:$0xff]  ;;  %v313_v7 = vld [vmem:[#allocation2 + $0x88] sm:$0xff]  ;;  %vm146_vm3 = vcmask 1043456  }
  0x28   :  { %1598 = vset.pattern.permute.xlu0 %v1681_v1  ;;  %1210 = vmatprep.subr.mxu1 %v1679_v0  ;;  %v56_v3 = vld [vmem:[%s1886_s1] sm:$0xf]  ;;  %v220_v8 = vld [vmem:[#allocation2] sm:$0xff]  ;;  %v221_v9 = vld [vmem:[#allocation2 + $0x8] sm:$0xff]  ;;  %vm142_vm4 = vcmask 31744   ;;  %v1446_v16 = vpack.c.bf16 %v313_v7, %v312_v6  ;;  %v1682_v22 = vmov 0.0|0.0  }
  0x29   :  { %1212 = vmatprep.mubr.msk.f32.mxu1 %vm1680_vm0, %v1679_v0  ;;  %v57_v4 = vld [vmem:[%s1887_s2] sm:$0xf]  ;;  %1206 = vmatpush3.msk.msra.mxu0 %vm67_vm1, %v55_v2  ;;  %v1079_v14 = vld [vmem:[%s1888_s3 + $0x8] sm:$0xff]  ;;  %v314_v17 = vld [vmem:[#allocation2 + $0x90] sm:$0xff]  ;;  %v1470_v18 = vpack.c.bf16 %v221_v9, %v220_v8 }
  0x2a   :  { %60 = vperm.xlu0 %1598, %v57_v4   ;;  %1208 = vmatmul.mubr.msk.f32.vlgmr.msra.gmra.mrb[0].mxu0 %vm63_vm2, %v56_v3  ;;  %v957_v5 = vld [vmem:[%s1889_s4] sm:$0xff]  ;;  %v222_v20 = vld [vmem:[#allocation2 + $0x10] sm:$0xff]  ;;  %v316_v24 = vld [vmem:[#allocation2 + $0xa0] sm:$0xff] }
  0x2b   :  { %1215 = vmatprep.subr.mxu0 %v1679_v0  ;;  %1217 = vmatprep.mubr.msk.f32.mxu0 %vm1680_vm0, %v1679_v0  ;;  %v141_v15 = vld [vmem:[%s1888_s3] sm:$0xff]  ;;  %v317_v26 = vld [vmem:[#allocation2 + $0xa8] sm:$0xff]  ;;  %v224_v27 = vld [vmem:[#allocation2 + $0x20] sm:$0xff] }
  0x2c   :  { %v315_v19 = vld [vmem:[#allocation2 + $0x98] sm:$0xff]  ;;  %v225_v28 = vld [vmem:[#allocation2 + $0x28] sm:$0xff]  ;;  %v1452_v29 = vpack.c.bf16 %v317_v26, %v316_v24  ;;  %v318_v30 = vld [vmem:[#allocation2 + $0xb0] sm:$0xff] }
  0x2d   :  { %v223_v21 = vld [vmem:[#allocation2 + $0x18] sm:$0xff]  ;;  %v1449_v23 = vpack.c.bf16 %v315_v19, %v314_v17  ;;  %v1476_v31 = vpack.c.bf16 %v225_v28, %v224_v27  ;;  %v226_v33 = vld [vmem:[#allocation2 + $0x30] sm:$0xff]  ;;  %v320_v36 = vld [vmem:[#allocation2 + $0xc0] sm:$0xff] }
  0x2e   :  { %960 = vperm.xlu0 %1598, %v957_v5   ;;  %v1473_v25 = vpack.c.bf16 %v223_v21, %v222_v20  ;;  %v319_v32 = vld [vmem:[#allocation2 + $0xb8] sm:$0xff]  ;;  %v321_v38 = vld [vmem:[#allocation2 + $0xc8] sm:$0xff]  ;;  %v228_v39 = vld [vmem:[#allocation2 + $0x40] sm:$0xff] }
  0x2f   :  { %v227_v34 = vld [vmem:[#allocation2 + $0x38] sm:$0xff]  ;;  %v1455_v35 = vpack.c.bf16 %v319_v32, %v318_v30  ;;  %v229_v40 = vld [vmem:[#allocation2 + $0x48] sm:$0xff]  ;;  %v1458_v41 = vpack.c.bf16 %v321_v38, %v320_v36  ;;  %v322_v42 = vld [vmem:[#allocation2 + $0xd0] sm:$0xff] }
  0x30   :  { %v1479_v37 = vpack.c.bf16 %v227_v34, %v226_v33  ;;  %v1482_v43 = vpack.c.bf16 %v229_v40, %v228_v39  ;;  %v323_v44 = vld [vmem:[#allocation2 + $0xd8] sm:$0xff]  ;;  %v230_v45 = vld [vmem:[#allocation2 + $0x50] sm:$0xff]  ;;  %v324_v48 = vld [vmem:[#allocation2 + $0xe0] sm:$0xff] }
  0x31   :  { %v231_v46 = vld [vmem:[#allocation2 + $0x58] sm:$0xff]  ;;  %v1461_v47 = vpack.c.bf16 %v323_v44, %v322_v42  ;;  %v325_v50 = vld [vmem:[#allocation2 + $0xe8] sm:$0xff]  ;;  %v232_v51 = vld [vmem:[#allocation2 + $0x60] sm:$0xff] }
  0x32   :  { %v1485_v49 = vpack.c.bf16 %v231_v46, %v230_v45  ;;  %v233_v52 = vld [vmem:[#allocation2 + $0x68] sm:$0xff]  ;;  %v1464_v53 = vpack.c.bf16 %v325_v50, %v324_v48  ;;  %v326_v55 = vld [vmem:[#allocation2 + $0xf0] sm:$0xff]  ;;  %v327_v56 = vld [vmem:[#allocation2 + $0xf8] sm:$0xff] }
  0x33   :  { %v1488_v54 = vpack.c.bf16 %v233_v52, %v232_v51  ;;  %v1467_v57 = vpack.c.bf16 %v327_v56, %v326_v55  ;;  %v234_v58 = vld [vmem:[#allocation2 + $0x70] sm:$0xff]  ;;  %v235_v59 = vld [vmem:[#allocation2 + $0x78] sm:$0xff]  ;;  %v544_v61 = vld [vmem:[#allocation2 + $0x100] sm:$0xff] }
  0x34   :  { %v1491_v60 = vpack.c.bf16 %v235_v59, %v234_v58  ;;  %v545_v62 = vld [vmem:[#allocation2 + $0x108] sm:$0xff]  ;;  %v546_v3 = vld [vmem:[#allocation2 + $0x110] sm:$0xff]  ;;  %v547_v4 = vld [vmem:[#allocation2 + $0x118] sm:$0xff] }
  0x35   :  { %v1494_v63 = vpack.c.bf16 %v545_v62, %v544_v61  ;;  %v1082_v7 = vld [vmem:[%s1888_s3 + $0x10] sm:$0xff]  ;;  %v1497_v8 = vpack.c.bf16 %v547_v4, %v546_v3  ;;  %v707_v9 = vld [vmem:[#allocation2 + $0x180] sm:$0xff]  ;;  %v709_v17 = vld [vmem:[#allocation2 + $0x190] sm:$0xff] }
  0x36   :  { %v550_v19 = vld [vmem:[#allocation2 + $0x130] sm:$0xff]  ;;  %v551_v20 = vld [vmem:[#allocation2 + $0x138] sm:$0xff]  ;;  %v711_v24 = vld [vmem:[#allocation2 + $0x1a0] sm:$0xff] }
  0x37   :  { %v552_v26 = vld [vmem:[#allocation2 + $0x140] sm:$0xff]  ;;  %v553_v27 = vld [vmem:[#allocation2 + $0x148] sm:$0xff]  ;;  %v713_v30 = vld [vmem:[#allocation2 + $0x1b0] sm:$0xff] }
  0x38   :  { %v554_v32 = vld [vmem:[#allocation2 + $0x150] sm:$0xff]  ;;  %v555_v33 = vld [vmem:[#allocation2 + $0x158] sm:$0xff]  ;;  %v715_v36 = vld [vmem:[#allocation2 + $0x1c0] sm:$0xff] }
  0x39   :  { %v556_v38 = vld [vmem:[#allocation2 + $0x160] sm:$0xff]  ;;  %v557_v39 = vld [vmem:[#allocation2 + $0x168] sm:$0xff]  ;;  %v717_v42 = vld [vmem:[#allocation2 + $0x1d0] sm:$0xff] }
  0x3a   :  { %v558_v44 = vld [vmem:[#allocation2 + $0x170] sm:$0xff]  ;;  %v559_v45 = vld [vmem:[#allocation2 + $0x178] sm:$0xff]  ;;  %v719_v48 = vld [vmem:[#allocation2 + $0x1e0] sm:$0xff] }
  0x3b   :  { %v721_v51 = vld [vmem:[#allocation2 + $0x1f0] sm:$0xff]  ;;  %v722_v52 = vld [vmem:[#allocation2 + $0x1f8] sm:$0xff]  ;;  %v870_v59 = vld [vmem:[#allocation2 + $0x200] sm:$0xff] }
  0x3c   :  { %v873_v3 = vld [vmem:[#allocation2 + $0x218] sm:$0xff] }
  0xa9   :  { %v61_v10 = vpop.permute.xlu0 %60 }
  0xfd   :  { %v137_v11 = vpop.f32.mrb[0].mxu0 }
  0xfe   :  { %v1769_v12 = vadd.f32 %v137_v11, %v61_v10  ;;  %v1209_v13 = vpop.f32.mrb[1].mxu0  ;;  %v708_v10 = vld [vmem:[#allocation2 + $0x188] sm:$0xff]  ;;  %v548_v11 = vld [vmem:[#allocation2 + $0x120] sm:$0xff] }
  0xff   :  { %v549_v13 = vld [vmem:[#allocation2 + $0x128] sm:$0xff] }
 0x100   :  { %1211 = vmatpush3.msk.msra.mxu1 %vm146_vm3, %v1769_v12  ;;  %1216 = vmatpush3.msk.msra.mxu0 %vm146_vm3, %v1769_v12 }
 0x101   :  { %1218 = vmatmul.mubr.msk.f32.vlgmr.msra.gmra.mrb[2].mxu0 %vm142_vm4, %v1079_v14  ;;  %1213 = vmatmul.mubr.msk.f32.vlgmr.msra.gmra.mrb[0].mxu1 %vm142_vm4, %v141_v15  ;;  %v1085_v14 = vld [vmem:[%s1888_s3 + $0x18] sm:$0xff]  ;;  %v1518_v15 = vpack.c.bf16 %v708_v10, %v707_v9  ;;  %v877_v10 = vld [vmem:[#allocation2 + $0x238] sm:$0xff] }
 0x102   :  { %1445 = vmatprep.subr.bf16.mxu1 %v1682_v22  ;;  %1469 = vmatprep.subr.bf16.mxu0 %v1682_v22  ;;  %v876_v9 = vld [vmem:[#allocation2 + $0x230] sm:$0xff] }
 0x103   :  { %1447 = vmatpush3.bf16.msra.mxu1 %v1446_v16  ;;  %1471 = vmatpush3.bf16.msra.mxu0 %v1470_v18  ;;  %v1500_v16 = vpack.c.bf16 %v549_v13, %v548_v11  ;;  %v710_v18 = vld [vmem:[#allocation2 + $0x198] sm:$0xff]  ;;  %v1551_v11 = vpack.c.bf16 %v877_v10, %v876_v9  ;;  %v878_v13 = vld [vmem:[#allocation2 + $0x240] sm:$0xff] }
 0x104   :  { %1448 = vmatprep.subr.bf16.mxu1 %v1682_v22  ;;  %1472 = vmatprep.subr.bf16.mxu0 %v1682_v22  ;;  %v1521_v21 = vpack.c.bf16 %v710_v18, %v709_v17  ;;  %v881_v17 = vld [vmem:[#allocation2 + $0x258] sm:$0xff]  ;;  %v882_v18 = vld [vmem:[#allocation2 + $0x260] sm:$0xff] }
 0x105   :  { %1252 = vmatprep.mubr.msk.f32.mxu1 %vm1680_vm0, %v1679_v0  ;;  %1287 = vmatprep.mubr.msk.f32.mxu0 %vm1680_vm0, %v1679_v0 }
 0x107   :  { %1450 = vmatpush3.bf16.msra.mxu1 %v1449_v23  ;;  %1474 = vmatpush3.bf16.msra.mxu0 %v1473_v25  ;;  %v1503_v23 = vpack.c.bf16 %v551_v20, %v550_v19  ;;  %v712_v25 = vld [vmem:[#allocation2 + $0x1a8] sm:$0xff] }
 0x108   :  { %1451 = vmatprep.subr.bf16.mxu1 %v1682_v22  ;;  %1475 = vmatprep.subr.bf16.mxu0 %v1682_v22  ;;  %v1524_v28 = vpack.c.bf16 %v712_v25, %v711_v24  ;;  %v883_v19 = vld [vmem:[#allocation2 + $0x268] sm:$0xff]  ;;  %v965_v25 = vld [vmem:[#allocation5] sm:$0xff] }
 0x109   :  { %v1560_v20 = vpack.c.bf16 %v883_v19, %v882_v18 }
 0x10b   :  { %1453 = vmatpush3.bf16.msra.mxu1 %v1452_v29  ;;  %1477 = vmatpush3.bf16.msra.mxu0 %v1476_v31  ;;  %v1506_v29 = vpack.c.bf16 %v553_v27, %v552_v26  ;;  %v714_v31 = vld [vmem:[#allocation2 + $0x1b8] sm:$0xff]  ;;  %v966_v26 = vld [vmem:[#allocation5 + $0x8] sm:$0xff]  ;;  %v967_v27 = vld [vmem:[#allocation5 + $0x10] sm:$0xff] }
 0x10c   :  { %1454 = vmatprep.subr.bf16.mxu1 %v1682_v22  ;;  %1478 = vmatprep.subr.bf16.mxu0 %v1682_v22  ;;  %v1527_v34 = vpack.c.bf16 %v714_v31, %v713_v30  ;;  %v969_v31 = vld [vmem:[#allocation5 + $0x20] sm:$0xff] }
 0x10f   :  { %1456 = vmatpush3.bf16.msra.mxu1 %v1455_v35  ;;  %1480 = vmatpush3.bf16.msra.mxu0 %v1479_v37  ;;  %v1509_v35 = vpack.c.bf16 %v555_v33, %v554_v32  ;;  %v716_v37 = vld [vmem:[#allocation2 + $0x1c8] sm:$0xff] }
 0x110   :  { %1457 = vmatprep.subr.bf16.mxu1 %v1682_v22  ;;  %1481 = vmatprep.subr.bf16.mxu0 %v1682_v22  ;;  %v1530_v40 = vpack.c.bf16 %v716_v37, %v715_v36  ;;  %v970_v32 = vld [vmem:[#allocation5 + $0x28] sm:$0xff]  ;;  %v973_v37 = vld [vmem:[#allocation5 + $0x40] sm:$0xff] }
 0x111   :  { %v1572_v33 = vpack.c.bf16 %v970_v32, %v969_v31 }
 0x113   :  { %1459 = vmatpush3.bf16.msra.mxu1 %v1458_v41  ;;  %1483 = vmatpush3.bf16.msra.mxu0 %v1482_v43  ;;  %v1512_v41 = vpack.c.bf16 %v557_v39, %v556_v38  ;;  %v718_v43 = vld [vmem:[#allocation2 + $0x1d8] sm:$0xff]  ;;  %v974_v38 = vld [vmem:[#allocation5 + $0x48] sm:$0xff] }
 0x114   :  { %1460 = vmatprep.subr.bf16.mxu1 %v1682_v22  ;;  %1484 = vmatprep.subr.bf16.mxu0 %v1682_v22  ;;  %v1533_v46 = vpack.c.bf16 %v718_v43, %v717_v42  ;;  %v1578_v39 = vpack.c.bf16 %v974_v38, %v973_v37 }
 0x117   :  { %1462 = vmatpush3.bf16.msra.mxu1 %v1461_v47  ;;  %1486 = vmatpush3.bf16.msra.mxu0 %v1485_v49  ;;  %v1515_v47 = vpack.c.bf16 %v559_v45, %v558_v44  ;;  %v720_v49 = vld [vmem:[#allocation2 + $0x1e8] sm:$0xff] }
 0x118   :  { %1463 = vmatprep.subr.bf16.mxu1 %v1682_v22  ;;  %1487 = vmatprep.subr.bf16.mxu0 %v1682_v22  ;;  %v1536_v50 = vpack.c.bf16 %v720_v49, %v719_v48 }
 0x11b   :  { %1465 = vmatpush3.bf16.msra.mxu1 %v1464_v53  ;;  %1489 = vmatpush3.bf16.msra.mxu0 %v1488_v54  ;;  %v1539_v53 = vpack.c.bf16 %v722_v52, %v721_v51  ;;  %v977_v51 = vld [vmem:[#allocation5 + $0x60] sm:$0xff]  ;;  %v978_v52 = vld [vmem:[#allocation5 + $0x68] sm:$0xff] }
 0x11c   :  { %1466 = vmatprep.subr.bf16.mxu1 %v1682_v22  ;;  %1490 = vmatprep.subr.bf16.mxu0 %v1682_v22 }
 0x11f   :  { %1468 = vmatpush3.bf16.msra.mxu1 %v1467_v57  ;;  %1492 = vmatpush3.bf16.msra.mxu0 %v1491_v60  ;;  %v871_v60 = vld [vmem:[#allocation2 + $0x208] sm:$0xff] }
 0x120   :  { %1290 = vmatprep.subr.mxu1 %v1679_v0  ;;  %1493 = vmatprep.subr.bf16.mxu0 %v1682_v22 }
 0x1d4   :  { %v307_v1 = vpop.f32.mrb[2].mxu0  ;;  %v216_v2 = vpop.f32.mrb[0].mxu1 }
 0x1d5   :  { %1253 = vmatmul.mubr.f32.vlgmr.msra.gmra.mrb[2].mxu1 %v307_v1  ;;  %v1219_v5 = vpop.f32.mrb[3].mxu0  ;;  %1288 = vmatmul.mubr.f32.vlgmr.msra.gmra.mrb[4].mxu0 %v216_v2  ;;  %v1214_v6 = vpop.f32.mrb[1].mxu1  ;;  %v1542_v1 = vpack.c.bf16 %v871_v60, %v870_v59  ;;  %v872_v2 = vld [vmem:[#allocation2 + $0x210] sm:$0xff] }
 0x1d6   :  { %1291 = vmatpush3.msk.msra.mxu1 %vm146_vm3, %v1769_v12  ;;  %1292 = vmatprep.mubr.msk.f32.mxu1 %vm1680_vm0, %v1679_v0  ;;  %v1545_v6 = vpack.c.bf16 %v873_v3, %v872_v2  ;;  %v961_v60 = vpop.permute.xlu0 %960 }
 0x1d7   :  { %1330 = vmatprep.subr.mxu1 %v1679_v0  ;;  %1495 = vmatpush3.bf16.msra.mxu0 %v1494_v63  ;;  %v1088_v63 = vld [vmem:[%s1888_s3 + $0x20] sm:$0xff]  ;;  %s1683_s3 = smov [#allocation7]  }
 0x1d8   :  { %1496 = vmatprep.subr.bf16.mxu0 %v1682_v22  ;;  %1327 = vmatprep.mubr.msk.f32.mxu0 %vm1680_vm0, %v1679_v0  ;;  %s1065_s16 = sshll.u32 %s1683_s3, 4  ;;  %s1066_s16 = int_to_ptr.vmem [resolvable:$true] %s1065_s16 }
 0x1d9   :  { %1293 = vmatmul.mubr.msk.f32.vlgmr.msra.gmra.mrb[4].mxu1 %vm142_vm4, %v1082_v7  ;;  %v875_v7 = vld [vmem:[#allocation2 + $0x228] sm:$0xff]  ;;  %s1647_s17 = scalar_lea.vmem %s1066_s16, 128  ;;  %p1652_p3 = scmp.lt.s32.totalorder %s1066_s16, %s1066_s16 }
 0x1da   :  { %1331 = vmatpush3.msk.msra.mxu1 %vm146_vm3, %v1769_v12  ;;  %1332 = vmatprep.mubr.msk.f32.mxu1 %vm1680_vm0, %v1679_v0  ;;  %p1648_p2 = scmp.ne.s32.totalorder %s1066_s16, %s1647_s17  ;;  %p1653_p4 = scmp.lt.s32.totalorder %s1647_s17, %s1647_s17 }
 0x1db   :  { %1498 = vmatpush3.bf16.msra.mxu0 %v1497_v8  ;;  %1517 = vmatprep.subr.bf16.mxu1 %v1682_v22 }
 0x1dc   :  { %1499 = vmatprep.subr.bf16.mxu0 %v1682_v22  ;;  %p1654_p5 = por %p1653_p4, %p1652_p3 }
 0x1dd   :  { %1333 = vmatmul.mubr.msk.f32.vlgmr.msra.gmra.mrb[6].mxu1 %vm142_vm4, %v1085_v14  ;;  %v879_v14 = vld [vmem:[#allocation2 + $0x248] sm:$0xff] }
 0x1de   :  { %1519 = vmatpush3.bf16.msra.mxu1 %v1518_v15  ;;  %1367 = vmatprep.mubr.msk.f32.mxu1 %vm1680_vm0, %v1679_v0  ;;  %v1554_v15 = vpack.c.bf16 %v879_v14, %v878_v13  ;;  %p1655_p6 = pnand %p1654_p5, %p1648_p2 }
 0x1df   :  { %1501 = vmatpush3.bf16.msra.mxu0 %v1500_v16  ;;  %1520 = vmatprep.subr.bf16.mxu1 %v1682_v22  ;;  %v880_v16 = vld [vmem:[#allocation2 + $0x250] sm:$0xff] }
 0x1e0   :  { %1502 = vmatprep.subr.bf16.mxu0 %v1682_v22 }
 0x1e2   :  { %1522 = vmatpush3.bf16.msra.mxu1 %v1521_v21  ;;  %v884_v21 = vld [vmem:[#allocation2 + $0x270] sm:$0xff] }
 0x1e3   :  { %1504 = vmatpush3.bf16.msra.mxu0 %v1503_v23  ;;  %1523 = vmatprep.subr.bf16.mxu1 %v1682_v22  ;;  %v885_v23 = vld [vmem:[#allocation2 + $0x278] sm:$0xff] }
 0x1e4   :  { %1505 = vmatprep.subr.bf16.mxu0 %v1682_v22  ;;  %v1563_v24 = vpack.c.bf16 %v885_v23, %v884_v21 }
 0x1e6   :  { %1525 = vmatpush3.bf16.msra.mxu1 %v1524_v28  ;;  %v1566_v28 = vpack.c.bf16 %v966_v26, %v965_v25 }
 0x1e7   :  { %1507 = vmatpush3.bf16.msra.mxu0 %v1506_v29  ;;  %1526 = vmatprep.subr.bf16.mxu1 %v1682_v22  ;;  %v968_v29 = vld [vmem:[#allocation5 + $0x18] sm:$0xff] }
 0x1e8   :  { %1508 = vmatprep.subr.bf16.mxu0 %v1682_v22  ;;  %v1569_v30 = vpack.c.bf16 %v968_v29, %v967_v27 }
 0x1ea   :  { %1528 = vmatpush3.bf16.msra.mxu1 %v1527_v34  ;;  %v971_v34 = vld [vmem:[#allocation5 + $0x30] sm:$0xff] }
 0x1eb   :  { %1510 = vmatpush3.bf16.msra.mxu0 %v1509_v35  ;;  %1529 = vmatprep.subr.bf16.mxu1 %v1682_v22  ;;  %v972_v35 = vld [vmem:[#allocation5 + $0x38] sm:$0xff] }
 0x1ec   :  { %1511 = vmatprep.subr.bf16.mxu0 %v1682_v22  ;;  %v1575_v36 = vpack.c.bf16 %v972_v35, %v971_v34 }
 0x1ee   :  { %1531 = vmatpush3.bf16.msra.mxu1 %v1530_v40  ;;  %v975_v40 = vld [vmem:[#allocation5 + $0x50] sm:$0xff] }
 0x1ef   :  { %1513 = vmatpush3.bf16.msra.mxu0 %v1512_v41  ;;  %1532 = vmatprep.subr.bf16.mxu1 %v1682_v22  ;;  %v976_v41 = vld [vmem:[#allocation5 + $0x58] sm:$0xff] }
 0x1f0   :  { %1514 = vmatprep.subr.bf16.mxu0 %v1682_v22  ;;  %v1581_v42 = vpack.c.bf16 %v976_v41, %v975_v40 }
 0x1f2   :  { %1534 = vmatpush3.bf16.msra.mxu1 %v1533_v46 }
 0x1f3   :  { %1516 = vmatpush3.bf16.msra.mxu0 %v1515_v47  ;;  %1535 = vmatprep.subr.bf16.mxu1 %v1682_v22 }
 0x1f4   :  { %1370 = vmatprep.subr.mxu0 %v1679_v0 }
 0x1f6   :  { %1537 = vmatpush3.bf16.msra.mxu1 %v1536_v50 }
 0x1f7   :  { %1538 = vmatprep.subr.bf16.mxu1 %v1682_v22 }
 0x1fa   :  { %1540 = vmatpush3.bf16.msra.mxu1 %v1539_v53  ;;  %v1584_v53 = vpack.c.bf16 %v978_v52, %v977_v51 }
 0x1fb   :  { %1565 = vmatprep.subr.bf16.mxu1 %v1682_v22 }
 0x2a8   :  { %v394_v54 = vpop.f32.mrb[2].mxu1  ;;  %v464_v55 = vpop.f32.mrb[4].mxu0 }
 0x2a9   :  { %v1254_v56 = vpop.f32.mrb[3].mxu1  ;;  %v1843_v57 = vadd.f32 %v464_v55, %v394_v54  ;;  %v1289_v58 = vpop.f32.mrb[5].mxu0  ;;  %v979_v54 = vld [vmem:[#allocation5 + $0x70] sm:$0xff]  ;;  %v980_v55 = vld [vmem:[#allocation5 + $0x78] sm:$0xff] }
 0x2aa   :  { %v1587_v56 = vpack.c.bf16 %v980_v55, %v979_v54 }
 0x2ac   :  { %v539_v61 = vpop.f32.mrb[4].mxu1 }
 0x2ad   :  { %1328 = vmatmul.mubr.f32.vlgmr.msra.gmra.mrb[6].mxu0 %v539_v61  ;;  %v1294_v62 = vpop.f32.mrb[5].mxu1 }
 0x2ae   :  { %1371 = vmatpush3.msk.msra.mxu0 %vm146_vm3, %v1769_v12  ;;  %1372 = vmatprep.mubr.msk.f32.mxu0 %vm1680_vm0, %v1679_v0  ;;  %v874_v12 = vld [vmem:[#allocation2 + $0x220] sm:$0xff] }
 0x2af   :  { %1541 = vmatprep.subr.bf16.mxu0 %v1682_v22  ;;  %v1548_v8 = vpack.c.bf16 %v875_v7, %v874_v12 }
 0x2b0   :  { %v702_v4 = vpop.f32.mrb[6].mxu1 }
 0x2b1   :  { %1368 = vmatmul.mubr.f32.vlgmr.msra.gmra.mrb[8].mxu1 %v702_v4  ;;  %1373 = vmatmul.mubr.msk.f32.vlgmr.msra.gmra.mrb[8].mxu0 %vm142_vm4, %v1088_v63  ;;  %v1334_v5 = vpop.f32.mrb[7].mxu1 }
 0x2b2   :  { %1543 = vmatpush3.bf16.msra.mxu0 %v1542_v1  ;;  %1407 = vmatprep.mubr.msk.f32.mxu0 %vm1680_vm0, %v1679_v0 }
 0x2b3   :  { %1544 = vmatprep.subr.bf16.mxu0 %v1682_v22  ;;  %1442 = vmatprep.mubr.msk.f32.mxu1 %vm1680_vm0, %v1679_v0  ;;  %v1557_v0 = vpack.c.bf16 %v881_v17, %v880_v16 }
 0x2b4   :  { %1567 = vmatpush3.bf16.msra.mxu1 %v1566_v28 }
 0x2b5   :  { %1568 = vmatprep.subr.bf16.mxu1 %v1682_v22 }
 0x2b6   :  { %1546 = vmatpush3.bf16.msra.mxu0 %v1545_v6 }
 0x2b7   :  { %1547 = vmatprep.subr.bf16.mxu0 %v1682_v22 }
 0x2b8   :  { %1570 = vmatpush3.bf16.msra.mxu1 %v1569_v30 }
 0x2b9   :  { %1571 = vmatprep.subr.bf16.mxu1 %v1682_v22 }
 0x2ba   :  { %1549 = vmatpush3.bf16.msra.mxu0 %v1548_v8 }
 0x2bb   :  { %1550 = vmatprep.subr.bf16.mxu0 %v1682_v22 }
 0x2bc   :  { %1573 = vmatpush3.bf16.msra.mxu1 %v1572_v33 }
 0x2bd   :  { %1574 = vmatprep.subr.bf16.mxu1 %v1682_v22 }
 0x2be   :  { %1552 = vmatpush3.bf16.msra.mxu0 %v1551_v11 }
 0x2bf   :  { %1553 = vmatprep.subr.bf16.mxu0 %v1682_v22 }
 0x2c0   :  { %1576 = vmatpush3.bf16.msra.mxu1 %v1575_v36 }
 0x2c1   :  { %1577 = vmatprep.subr.bf16.mxu1 %v1682_v22 }
 0x2c2   :  { %1555 = vmatpush3.bf16.msra.mxu0 %v1554_v15 }
 0x2c3   :  { %1556 = vmatprep.subr.bf16.mxu0 %v1682_v22 }
 0x2c4   :  { %1579 = vmatpush3.bf16.msra.mxu1 %v1578_v39 }
 0x2c5   :  { %1580 = vmatprep.subr.bf16.mxu1 %v1682_v22 }
 0x2c6   :  { %1558 = vmatpush3.bf16.msra.mxu0 %v1557_v0 }
 0x2c7   :  { %1559 = vmatprep.subr.bf16.mxu0 %v1682_v22 }
 0x2c8   :  { %1582 = vmatpush3.bf16.msra.mxu1 %v1581_v42 }
 0x2c9   :  { %1583 = vmatprep.subr.bf16.mxu1 %v1682_v22 }
 0x2ca   :  { %1561 = vmatpush3.bf16.msra.mxu0 %v1560_v20 }
 0x2cb   :  { %1562 = vmatprep.subr.bf16.mxu0 %v1682_v22 }
 0x2cc   :  { %1585 = vmatpush3.bf16.msra.mxu1 %v1584_v53 }
 0x2cd   :  { %1586 = vmatprep.subr.bf16.mxu1 %v1682_v22 }
 0x2ce   :  { %1564 = vmatpush3.bf16.msra.mxu0 %v1563_v24 }
 0x2d0   :  { %1588 = vmatpush3.bf16.msra.mxu1 %v1587_v56 }
 0x380   :  { %v626_v43 = vpop.f32.mrb[6].mxu0 }
 0x381   :  { %v630_v44 = vadd.f32 %v626_v43, %v1843_v57  ;;  %v1329_v45 = vpop.f32.mrb[7].mxu0 }
 0x384   :  { %v789_v46 = vpop.f32.mrb[8].mxu1  ;;  %v865_v47 = vpop.f32.mrb[8].mxu0 }
 0x385   :  { %v793_v48 = vadd.f32 %v789_v46, %v630_v44  ;;  %1408 = vmatmul.mubr.f32.vlgmr.msra.gmra.mrb[10].mxu0 %v865_v47  ;;  %v1374_v49 = vpop.f32.mrb[9].mxu0  ;;  %v1369_v50 = vpop.f32.mrb[9].mxu1 }
 0x458   :  { %v952_v58 = vpop.f32.mrb[10].mxu0 }
 0x459   :  { %v956_v59 = vadd.f32 %v952_v58, %v793_v48  ;;  %v1409_v57 = vpop.f32.mrb[11].mxu0 }
 0x45b   :  { %v963_v61 = vadd.f32 %v961_v60, %v956_v59 }
 0x45d   :  { %v964_v62 = vmul.f32 %v963_v61, %v963_v61 }
 0x45f   :  { %1443 = vmatmul.mubr.f32.vlgmr.msra.gmra.mrb[10].mxu1 %v964_v62 }
 0x532   :  { %v1047_v63 = vpop.f32.mrb[10].mxu1 }
 0x533   :  { %v1051_v1 = vadd.f32 1.0, %v1047_v63  ;;  %v1444_v2 = vpop.f32.mrb[11].mxu1  ;;  %v1055_v3 = vadd.f32 1e-08, %v1047_v63 }
 0x535   :  { %1599 = vrcp.f32 %v1051_v1 }
 0x536   :  { %1601 = vrcp.f32 %v1055_v3 }
 0x53f   :  { %v1600_v4 = vpop.eup %1599 }
 0x540   :  { %v1053_v5 = vmul.f32 %v1600_v4, %v1047_v63  ;;  %v1602_v6 = vpop.eup %1601 }
 0x542   :  { %v1054_v22 = vmul.f32 %v1053_v5, %v963_v61 }
 0x544   :  { %v1057_v12 = vmul.f32 %v1602_v6, %v1054_v22 }
 0x546   :  { %1058 = vst [vmem:[#allocation7] sm:$0xff] %v1057_v12 }
 0x547   :  { %1658 = shalt.err (!%p1655_p6)
}
 0x548   :  { %s1659_s20 = scalar_lea.hbm %s1892_s7, 128 }
 0x549   :  { %p1660_p7 = scmp.ne.s32.totalorder %s1892_s7, %s1659_s20  ;;  %p1663_p8 = scmp.lt.u32.totalorder %s1659_s20, %s1892_s7 }
 0x54b   :  { %p1665_p9 = pnand %p1663_p8, %p1660_p7 }
 0x54d   :  { %1668 = shalt.err (!%p1665_p9)
}
 0x54e   :  { %1068 = dma.vmem_to_hbm [thread:$0]  %s1066_s16, 128, %s1892_s7, [#allocation4]  }
 0x54f   :  { %1673 = dma.done.wait [#allocation4], 128  }
 0x550   :  { %1674 = vsyncadd [#allocation4], 4294967168 }
 0x551   :  { %1072 = vsyncpa [#allocation3], 1 }
 0x552   :  { %1073 = vsyncpa [#allocation6], 1 }
 0x553   :  { %1074 = vsyncpa [#allocation4], 1 }

</bundles_post_ra>
